<compile_context>
chip_gen: v5e
topology: v5e:2x2
jax: 0.10.0
libtpu: 0.0.40
codegen_flags: <defaults>
</compile_context>

<pallas_src>
import functools

import jax
import jax.numpy as jnp
from jax.experimental import pallas as pl
from jax.experimental.pallas import tpu as pltpu


def _objectsize_kernel(w_ref, b_ref, x_ref, o_ref, *, cin, cout, nb):
    # w_ref: SMEM (cout*cin,) f32   flattened conv weight, row-major [co, ci]
    # b_ref: SMEM (cout,)     f32
    # x_ref: VMEM (nb, cin,  TR, 128)   lane-dense pixel tile
    # o_ref: VMEM (nb, cout, TR, 128)
    for b in range(nb):
        accs = [None] * cout
        for ci in range(cin):
            xi = x_ref[b, ci].astype(jnp.float32)          # (TR, 128) full vregs
            for co in range(cout):
                term = xi * w_ref[co * cin + ci]
                accs[co] = term if ci == 0 else accs[co] + term
        for co in range(cout):
            o_ref[b, co] = jnp.tanh(accs[co] + b_ref[co]).astype(o_ref.dtype)


def _choose_tiling(n, cin, cout, rows, itemsize):
    """Pick (batch_block, row_tile) for the (n, c, rows, 128) layout."""
    bytes_per_row = (cin + cout) * 128 * itemsize      # in + out traffic per 128-px row
    total_bytes = n * rows * bytes_per_row

    TINY_BYTES = 512 << 10          # below this, one grid step beats any tiling
    TARGET_STEP_BYTES = 4 << 20     # ~4 MiB traffic per grid step
    VMEM_BUDGET = 10 << 20          # double-buffered in+out, safe on v5e/v6e/v7x

    if total_bytes <= TINY_BYTES:
        return n, rows              # single grid step: whole problem in one block

    nb = 1
    tr = max(8, TARGET_STEP_BYTES // bytes_per_row)
    tr = min(tr, max(8, VMEM_BUDGET // (2 * bytes_per_row)))
    # Keep >=2 pixel tiles when the batch axis can't feed both v7x TensorCores.
    if n < 2 and rows > 8:
        tr = min(tr, ((pl.cdiv(rows, 2) + 7) // 8) * 8)
    if tr >= rows:
        tr = rows                   # full extent is always a legal block dim
    else:
        tr = max(8, (tr // 8) * 8)  # (8,128) constraint on the block's sublane dim
    return nb, tr


@jax.jit
def object_size_net_forward(x_nchw, weight, bias):
    """x_nchw: (N, Cin, H, W); weight: (Cout, Cin, 1, 1); bias: (Cout,)."""
    n, cin, h, w = x_nchw.shape
    cout = weight.shape[0]
    p = h * w
    itemsize = jnp.dtype(x_nchw.dtype).itemsize

    # Free view NCHW -> (N, Cin, P); pad P to a multiple of 128 so every shape
    # gets lane-dense, pipelined 128-wide tiles (padded pixels are sliced off).
    x3 = x_nchw.reshape(n, cin, p)
    p_pad = ((p + 127) // 128) * 128
    if p_pad != p:
        x3 = jnp.pad(x3, ((0, 0), (0, 0), (0, p_pad - p)))
    rows = p_pad // 128
    x4 = x3.reshape(n, cin, rows, 128)   # contiguous view: pixels -> (rows, 128)

    nb, tr = _choose_tiling(n, cin, cout, rows, itemsize)
    grid = (pl.cdiv(n, nb), pl.cdiv(rows, tr))

    w_flat = weight.reshape(cout * cin).astype(jnp.float32)   # index co*cin + ci
    b_flat = bias.reshape(cout).astype(jnp.float32)

    kernel = functools.partial(_objectsize_kernel, cin=cin, cout=cout, nb=nb)

    cost = pl.CostEstimate(
        flops=2 * n * p * cin * cout,
        transcendentals=n * p * cout,
        bytes_accessed=n * p * (cin + cout) * itemsize,
    )

    out4 = pl.pallas_call(
        kernel,
        out_shape=jax.ShapeDtypeStruct((n, cout, rows, 128), x_nchw.dtype),
        grid_spec=pltpu.PrefetchScalarGridSpec(
            num_scalar_prefetch=2,      # weight + bias scalars land in SMEM
            grid=grid,
            in_specs=[
                pl.BlockSpec((nb, cin, tr, 128), lambda bi, j, *_: (bi, 0, j, 0)),
            ],
            out_specs=pl.BlockSpec((nb, cout, tr, 128), lambda bi, j, *_: (bi, 0, j, 0)),
        ),
        compiler_params=pltpu.CompilerParams(
            # Both grid axes are independent -> megacore sharding on v7x.
            dimension_semantics=("parallel", "parallel"),
            vmem_limit_bytes=32 << 20,
        ),
        cost_estimate=cost,
    )(w_flat, b_flat, x4)

    out3 = out4.reshape(n, cout, p_pad)
    if p_pad != p:
        out3 = out3[:, :, :p]
    return out3.reshape(n, cout, h, w)


if __name__ == "__main__":
    key = jax.random.PRNGKey(0)
    k_x, k_w, k_b = jax.random.split(key, 3)

    batch, in_channels, out_channels, spatial = 2, 4, 2, 16

    x = jax.random.normal(k_x, (batch, in_channels, spatial, spatial),
                          dtype=jnp.float32)
    # Deterministic "Conv2d(in_channels, out_channels, kernel_size=(1,1))" params.
    weight = jax.random.normal(k_w, (out_channels, in_channels, 1, 1),
                               dtype=jnp.float32) * 0.1
    bias = jax.random.normal(k_b, (out_channels,), dtype=jnp.float32) * 0.1

    out = object_size_net_forward(x, weight, bias)
    out = jax.block_until_ready(out)

    # Reference check in plain JAX: 1x1 conv == per-pixel channel matmul.
    ref = jnp.tanh(
        jnp.einsum("nchw,oc->nohw", x, weight.reshape(out_channels, in_channels))
        + bias[None, :, None, None]
    )
    assert out.shape == (batch, out_channels, spatial, spatial)
    assert jnp.allclose(out, ref, atol=1e-5, rtol=1e-5)

    # Extra check: a larger, non-128-divisible pixel plane exercises the
    # padding + partial-tile path.
    x2 = jax.random.normal(k_x, (1, in_channels, 67, 45), dtype=jnp.float32)
    out2 = jax.block_until_ready(object_size_net_forward(x2, weight, bias))
    ref2 = jnp.tanh(
        jnp.einsum("nchw,oc->nohw", x2, weight.reshape(out_channels, in_channels))
        + bias[None, :, None, None]
    )
    assert jnp.allclose(out2, ref2, atol=1e-5, rtol=1e-5)

    print("KERNEL_OK")
</pallas_src>

<mosaic_0001>
module attributes {stable_mosaic.version = 11 : i64} {
  func.func @_objectsize_kernel(%arg0: i32, %arg1: i32, %arg2: memref<8xf32, #tpu.memory_space<smem>>, %arg3: memref<2xf32, #tpu.memory_space<smem>>, %arg4: memref<2x4x2x128xf32, #tpu.memory_space<vmem>>, %arg5: memref<2x2x2x128xf32, #tpu.memory_space<vmem>>) attributes {dimension_semantics = [#tpu.dimension_semantics<parallel>, #tpu.dimension_semantics<parallel>], iteration_bounds = array<i64: 1, 1>, scalar_prefetch = 2 : i64, scratch_operands = 0 : i64, tpu.core_type = #tpu.core_type<tc>, window_params = [{transform_indices = @transform_0, window_bounds = array<i64: 2, 4, 2, 128>}, {transform_indices = @transform_1, window_bounds = array<i64: 2, 2, 2, 128>}]} {
    %c0 = arith.constant 0 : index
    %c0_0 = arith.constant 0 : index
    %c0_1 = arith.constant 0 : index
    %c0_2 = arith.constant 0 : index
    %0 = vector.load %arg4[%c0, %c0_0, %c0_1, %c0_2] : memref<2x4x2x128xf32, #tpu.memory_space<vmem>>, vector<1x1x2x128xf32>
    %1 = vector.shape_cast %0 : vector<1x1x2x128xf32> to vector<2x128xf32>
    %c0_3 = arith.constant 0 : index
    %2 = memref.load %arg2[%c0_3] : memref<8xf32, #tpu.memory_space<smem>>
    %3 = vector.broadcast %2 : f32 to vector<2x128xf32>
    %4 = arith.mulf %1, %3 : vector<2x128xf32>
    %c4 = arith.constant 4 : index
    %5 = memref.load %arg2[%c4] : memref<8xf32, #tpu.memory_space<smem>>
    %6 = vector.broadcast %5 : f32 to vector<2x128xf32>
    %7 = arith.mulf %1, %6 : vector<2x128xf32>
    %c0_4 = arith.constant 0 : index
    %c1 = arith.constant 1 : index
    %c0_5 = arith.constant 0 : index
    %c0_6 = arith.constant 0 : index
    %8 = vector.load %arg4[%c0_4, %c1, %c0_5, %c0_6] : memref<2x4x2x128xf32, #tpu.memory_space<vmem>>, vector<1x1x2x128xf32>
    %9 = vector.shape_cast %8 : vector<1x1x2x128xf32> to vector<2x128xf32>
    %c1_7 = arith.constant 1 : index
    %10 = memref.load %arg2[%c1_7] : memref<8xf32, #tpu.memory_space<smem>>
    %11 = vector.broadcast %10 : f32 to vector<2x128xf32>
    %12 = arith.mulf %9, %11 : vector<2x128xf32>
    %13 = arith.addf %4, %12 : vector<2x128xf32>
    %c5 = arith.constant 5 : index
    %14 = memref.load %arg2[%c5] : memref<8xf32, #tpu.memory_space<smem>>
    %15 = vector.broadcast %14 : f32 to vector<2x128xf32>
    %16 = arith.mulf %9, %15 : vector<2x128xf32>
    %17 = arith.addf %7, %16 : vector<2x128xf32>
    %c0_8 = arith.constant 0 : index
    %c2 = arith.constant 2 : index
    %c0_9 = arith.constant 0 : index
    %c0_10 = arith.constant 0 : index
    %18 = vector.load %arg4[%c0_8, %c2, %c0_9, %c0_10] : memref<2x4x2x128xf32, #tpu.memory_space<vmem>>, vector<1x1x2x128xf32>
    %19 = vector.shape_cast %18 : vector<1x1x2x128xf32> to vector<2x128xf32>
    %c2_11 = arith.constant 2 : index
    %20 = memref.load %arg2[%c2_11] : memref<8xf32, #tpu.memory_space<smem>>
    %21 = vector.broadcast %20 : f32 to vector<2x128xf32>
    %22 = arith.mulf %19, %21 : vector<2x128xf32>
    %23 = arith.addf %13, %22 : vector<2x128xf32>
    %c6 = arith.constant 6 : index
    %24 = memref.load %arg2[%c6] : memref<8xf32, #tpu.memory_space<smem>>
    %25 = vector.broadcast %24 : f32 to vector<2x128xf32>
    %26 = arith.mulf %19, %25 : vector<2x128xf32>
    %27 = arith.addf %17, %26 : vector<2x128xf32>
    %c0_12 = arith.constant 0 : index
    %c3 = arith.constant 3 : index
    %c0_13 = arith.constant 0 : index
    %c0_14 = arith.constant 0 : index
    %28 = vector.load %arg4[%c0_12, %c3, %c0_13, %c0_14] : memref<2x4x2x128xf32, #tpu.memory_space<vmem>>, vector<1x1x2x128xf32>
    %29 = vector.shape_cast %28 : vector<1x1x2x128xf32> to vector<2x128xf32>
    %c3_15 = arith.constant 3 : index
    %30 = memref.load %arg2[%c3_15] : memref<8xf32, #tpu.memory_space<smem>>
    %31 = vector.broadcast %30 : f32 to vector<2x128xf32>
    %32 = arith.mulf %29, %31 : vector<2x128xf32>
    %33 = arith.addf %23, %32 : vector<2x128xf32>
    %c7 = arith.constant 7 : index
    %34 = memref.load %arg2[%c7] : memref<8xf32, #tpu.memory_space<smem>>
    %35 = vector.broadcast %34 : f32 to vector<2x128xf32>
    %36 = arith.mulf %29, %35 : vector<2x128xf32>
    %37 = arith.addf %27, %36 : vector<2x128xf32>
    %c0_16 = arith.constant 0 : index
    %38 = memref.load %arg3[%c0_16] : memref<2xf32, #tpu.memory_space<smem>>
    %39 = vector.broadcast %38 : f32 to vector<2x128xf32>
    %40 = arith.addf %33, %39 : vector<2x128xf32>
    %41 = math.tanh %40 : vector<2x128xf32>
    %c0_17 = arith.constant 0 : index
    %c0_18 = arith.constant 0 : index
    %c0_19 = arith.constant 0 : index
    %c0_20 = arith.constant 0 : index
    %42 = vector.load %arg5[%c0_17, %c0_18, %c0_19, %c0_20] : memref<2x2x2x128xf32, #tpu.memory_space<vmem>>, vector<1x1x2x128xf32>
    %43 = vector.shape_cast %42 : vector<1x1x2x128xf32> to vector<2x128xf32>
    %44 = vector.shape_cast %41 : vector<2x128xf32> to vector<1x1x2x128xf32>
    tpu.vector_store %arg5[%c0_17, %c0_18, %c0_19, %c0_20], %44 {strides = array<i32>} : memref<2x2x2x128xf32, #tpu.memory_space<vmem>>, vector<1x1x2x128xf32>,
    %c1_21 = arith.constant 1 : index
    %45 = memref.load %arg3[%c1_21] : memref<2xf32, #tpu.memory_space<smem>>
    %46 = vector.broadcast %45 : f32 to vector<2x128xf32>
    %47 = arith.addf %37, %46 : vector<2x128xf32>
    %48 = math.tanh %47 : vector<2x128xf32>
    %c0_22 = arith.constant 0 : index
    %c1_23 = arith.constant 1 : index
    %c0_24 = arith.constant 0 : index
    %c0_25 = arith.constant 0 : index
    %49 = vector.load %arg5[%c0_22, %c1_23, %c0_24, %c0_25] : memref<2x2x2x128xf32, #tpu.memory_space<vmem>>, vector<1x1x2x128xf32>
    %50 = vector.shape_cast %49 : vector<1x1x2x128xf32> to vector<2x128xf32>
    %51 = vector.shape_cast %48 : vector<2x128xf32> to vector<1x1x2x128xf32>
    tpu.vector_store %arg5[%c0_22, %c1_23, %c0_24, %c0_25], %51 {strides = array<i32>} : memref<2x2x2x128xf32, #tpu.memory_space<vmem>>, vector<1x1x2x128xf32>,
    %c1_26 = arith.constant 1 : index
    %c0_27 = arith.constant 0 : index
    %c0_28 = arith.constant 0 : index
    %c0_29 = arith.constant 0 : index
    %52 = vector.load %arg4[%c1_26, %c0_27, %c0_28, %c0_29] : memref<2x4x2x128xf32, #tpu.memory_space<vmem>>, vector<1x1x2x128xf32>
    %53 = vector.shape_cast %52 : vector<1x1x2x128xf32> to vector<2x128xf32>
    %c0_30 = arith.constant 0 : index
    %54 = memref.load %arg2[%c0_30] : memref<8xf32, #tpu.memory_space<smem>>
    %55 = vector.broadcast %54 : f32 to vector<2x128xf32>
    %56 = arith.mulf %53, %55 : vector<2x128xf32>
    %c4_31 = arith.constant 4 : index
    %57 = memref.load %arg2[%c4_31] : memref<8xf32, #tpu.memory_space<smem>>
    %58 = vector.broadcast %57 : f32 to vector<2x128xf32>
    %59 = arith.mulf %53, %58 : vector<2x128xf32>
    %c1_32 = arith.constant 1 : index
    %c1_33 = arith.constant 1 : index
    %c0_34 = arith.constant 0 : index
    %c0_35 = arith.constant 0 : index
    %60 = vector.load %arg4[%c1_32, %c1_33, %c0_34, %c0_35] : memref<2x4x2x128xf32, #tpu.memory_space<vmem>>, vector<1x1x2x128xf32>
    %61 = vector.shape_cast %60 : vector<1x1x2x128xf32> to vector<2x128xf32>
    %c1_36 = arith.constant 1 : index
    %62 = memref.load %arg2[%c1_36] : memref<8xf32, #tpu.memory_space<smem>>
    %63 = vector.broadcast %62 : f32 to vector<2x128xf32>
    %64 = arith.mulf %61, %63 : vector<2x128xf32>
    %65 = arith.addf %56, %64 : vector<2x128xf32>
    %c5_37 = arith.constant 5 : index
    %66 = memref.load %arg2[%c5_37] : memref<8xf32, #tpu.memory_space<smem>>
    %67 = vector.broadcast %66 : f32 to vector<2x128xf32>
    %68 = arith.mulf %61, %67 : vector<2x128xf32>
    %69 = arith.addf %59, %68 : vector<2x128xf32>
    %c1_38 = arith.constant 1 : index
    %c2_39 = arith.constant 2 : index
    %c0_40 = arith.constant 0 : index
    %c0_41 = arith.constant 0 : index
    %70 = vector.load %arg4[%c1_38, %c2_39, %c0_40, %c0_41] : memref<2x4x2x128xf32, #tpu.memory_space<vmem>>, vector<1x1x2x128xf32>
    %71 = vector.shape_cast %70 : vector<1x1x2x128xf32> to vector<2x128xf32>
    %c2_42 = arith.constant 2 : index
    %72 = memref.load %arg2[%c2_42] : memref<8xf32, #tpu.memory_space<smem>>
    %73 = vector.broadcast %72 : f32 to vector<2x128xf32>
    %74 = arith.mulf %71, %73 : vector<2x128xf32>
    %75 = arith.addf %65, %74 : vector<2x128xf32>
    %c6_43 = arith.constant 6 : index
    %76 = memref.load %arg2[%c6_43] : memref<8xf32, #tpu.memory_space<smem>>
    %77 = vector.broadcast %76 : f32 to vector<2x128xf32>
    %78 = arith.mulf %71, %77 : vector<2x128xf32>
    %79 = arith.addf %69, %78 : vector<2x128xf32>
    %c1_44 = arith.constant 1 : index
    %c3_45 = arith.constant 3 : index
    %c0_46 = arith.constant 0 : index
    %c0_47 = arith.constant 0 : index
    %80 = vector.load %arg4[%c1_44, %c3_45, %c0_46, %c0_47] : memref<2x4x2x128xf32, #tpu.memory_space<vmem>>, vector<1x1x2x128xf32>
    %81 = vector.shape_cast %80 : vector<1x1x2x128xf32> to vector<2x128xf32>
    %c3_48 = arith.constant 3 : index
    %82 = memref.load %arg2[%c3_48] : memref<8xf32, #tpu.memory_space<smem>>
    %83 = vector.broadcast %82 : f32 to vector<2x128xf32>
    %84 = arith.mulf %81, %83 : vector<2x128xf32>
    %85 = arith.addf %75, %84 : vector<2x128xf32>
    %c7_49 = arith.constant 7 : index
    %86 = memref.load %arg2[%c7_49] : memref<8xf32, #tpu.memory_space<smem>>
    %87 = vector.broadcast %86 : f32 to vector<2x128xf32>
    %88 = arith.mulf %81, %87 : vector<2x128xf32>
    %89 = arith.addf %79, %88 : vector<2x128xf32>
    %c0_50 = arith.constant 0 : index
    %90 = memref.load %arg3[%c0_50] : memref<2xf32, #tpu.memory_space<smem>>
    %91 = vector.broadcast %90 : f32 to vector<2x128xf32>
    %92 = arith.addf %85, %91 : vector<2x128xf32>
    %93 = math.tanh %92 : vector<2x128xf32>
    %c1_51 = arith.constant 1 : index
    %c0_52 = arith.constant 0 : index
    %c0_53 = arith.constant 0 : index
    %c0_54 = arith.constant 0 : index
    %94 = vector.load %arg5[%c1_51, %c0_52, %c0_53, %c0_54] : memref<2x2x2x128xf32, #tpu.memory_space<vmem>>, vector<1x1x2x128xf32>
    %95 = vector.shape_cast %94 : vector<1x1x2x128xf32> to vector<2x128xf32>
    %96 = vector.shape_cast %93 : vector<2x128xf32> to vector<1x1x2x128xf32>
    tpu.vector_store %arg5[%c1_51, %c0_52, %c0_53, %c0_54], %96 {strides = array<i32>} : memref<2x2x2x128xf32, #tpu.memory_space<vmem>>, vector<1x1x2x128xf32>,
    %c1_55 = arith.constant 1 : index
    %97 = memref.load %arg3[%c1_55] : memref<2xf32, #tpu.memory_space<smem>>
    %98 = vector.broadcast %97 : f32 to vector<2x128xf32>
    %99 = arith.addf %89, %98 : vector<2x128xf32>
    %100 = math.tanh %99 : vector<2x128xf32>
    %c1_56 = arith.constant 1 : index
    %c1_57 = arith.constant 1 : index
    %c0_58 = arith.constant 0 : index
    %c0_59 = arith.constant 0 : index
    %101 = vector.load %arg5[%c1_56, %c1_57, %c0_58, %c0_59] : memref<2x2x2x128xf32, #tpu.memory_space<vmem>>, vector<1x1x2x128xf32>
    %102 = vector.shape_cast %101 : vector<1x1x2x128xf32> to vector<2x128xf32>
    %103 = vector.shape_cast %100 : vector<2x128xf32> to vector<1x1x2x128xf32>
    tpu.vector_store %arg5[%c1_56, %c1_57, %c0_58, %c0_59], %103 {strides = array<i32>} : memref<2x2x2x128xf32, #tpu.memory_space<vmem>>, vector<1x1x2x128xf32>,
    return
  }
  func.func @transform_0(%arg0: i32, %arg1: i32, %arg2: memref<8xf32, #tpu.memory_space<smem>>, %arg3: memref<2xf32, #tpu.memory_space<smem>>) -> (i32, i32, i32, i32) {
    %c0_i32 = arith.constant 0 : i32
    %c0_i32_0 = arith.constant 0 : i32
    %c0_i32_1 = arith.constant 0 : i32
    return %arg0, %c0_i32, %arg1, %c0_i32_0 : i32, i32, i32, i32
  }
  func.func @transform_1(%arg0: i32, %arg1: i32, %arg2: memref<8xf32, #tpu.memory_space<smem>>, %arg3: memref<2xf32, #tpu.memory_space<smem>>) -> (i32, i32, i32, i32) {
    %c0_i32 = arith.constant 0 : i32
    %c0_i32_0 = arith.constant 0 : i32
    %c0_i32_1 = arith.constant 0 : i32
    return %arg0, %c0_i32, %arg1, %c0_i32_0 : i32, i32, i32, i32
  }
}

</mosaic_0001>

<bundles_post_ra>
// kernel: object_size_net_forward.1
= control target key start
LH: loop header
LB: loop body
LE: loop exit
PB: predicated region body
PF: predicated region fallthrough
CT: control target
= control target key end

     0   :  { %s187_s18 = smov [#allocation3]   ;;  %s188_s19 = smov [#allocation4]   ;;  %s269_s0 = inlined_call_operand.vmem [shape: f32[8], index: 0, kind: input, shape index: {}]   ;;  %s270_s2 = inlined_call_operand.vmem [shape: f32[2,4,2,128], index: 2, kind: input, shape index: {}]   ;;  %s271_s3 = inlined_call_operand.vmem [shape: f32[2,2,2,128], index: 3, kind: output, shape index: {}]   ;;  %s272_s1 = inlined_call_operand.vmem [shape: f32[2], index: 1, kind: input, shape index: {}]  }
   0x1   :  { %s9_s14 = sshll.u32 %s269_s0, 4  ;;  %s14_s17 = sshll.u32 %s272_s1, 4  ;;  %s10_s14 = int_to_ptr.vmem [resolvable:$true] %s9_s14  ;;  %s15_s17 = int_to_ptr.vmem [resolvable:$true] %s14_s17 }
   0x2   :  { %12 = dma.vmem_to_smem %s10_s14, 16, %s187_s18, [#allocation2] }
   0x3   :  { %17 = dma.vmem_to_smem %s15_s17, 16, %s188_s19, [#allocation2] }
   0x4   :  { %185 = dma.done.wait [#allocation2], 32 }
   0x5   :  { %186 = vsyncadd [#allocation2], 4294967264 }
   0x6   :  { %20 = sfence }
   0x7   :  { %s24_s20 = sld [smem:[#allocation3]]  ;;  %v23_v0 = vld [vmem:[%s270_s2] sm:$0x3]  ;;  %v137_v1 = vld [vmem:[%s270_s2 + $0x8] sm:$0x3] }
   0x8   :  { %s127_s21 = sld [smem:[#allocation3 + $0x1]]  ;;  %v126_v2 = vld [vmem:[%s270_s2 + $0x2] sm:$0x3]  ;;  %v139_v3 = vld [vmem:[%s270_s2 + $0xa] sm:$0x3] }
   0x9   :  { %s130_s22 = sld [smem:[#allocation3 + $0x2]]  ;;  %v129_v5 = vld [vmem:[%s270_s2 + $0x4] sm:$0x3]  ;;  %v142_v6 = vld [vmem:[%s270_s2 + $0xc] sm:$0x3] }
   0xa   :  { %s215_s23 = sld [smem:[#allocation3 + $0x3]]  ;;  %v132_v9 = vld [vmem:[%s270_s2 + $0x6] sm:$0x3]  ;;  %v145_v14 = vld [vmem:[%s270_s2 + $0xe] sm:$0x3] }
   0xb   :  { %s220_s25 = sld [smem:[#allocation4]] }
   0xc   :  { %s228_s29 = sld [smem:[#allocation3 + $0x4]] }
   0xd   :  { %v25_v4 = vstv %s24_s20  ;;  %s128_s7 = sld [smem:[#allocation3 + $0x5]] }
   0xe   :  { %v26_v7 = vmul.f32 %v25_v4, %v23_v0  ;;  %v33_v8 = vstv %s127_s21  ;;  %s242_s12 = sld [smem:[#allocation3 + $0x6]]  ;;  %v75_v10 = vmul.f32 %v137_v1, %v25_v4 }
   0xf   :  { %v34_v11 = vmul.f32 %v126_v2, %v33_v8  ;;  %v43_v12 = vstv %s130_s22  ;;  %s244_s13 = sld [smem:[#allocation3 + $0x7]]  ;;  %v83_v13 = vmul.f32 %v139_v3, %v33_v8 }
  0x10   :  { %v44_v15 = vmul.f32 %v129_v5, %v43_v12  ;;  %v53_v16 = vstv %s215_s23  ;;  %v93_v17 = vmul.f32 %v142_v6, %v43_v12  ;;  %s250_s16 = sld [smem:[#allocation4 + $0x1]] }
  0x11   :  { %v35_v18 = vadd.f32 %v34_v11, %v26_v7  ;;  %v54_v19 = vmul.f32 %v132_v9, %v53_v16  ;;  %v84_v20 = vadd.f32 %v83_v13, %v75_v10  ;;  %v61_v21 = vstv %s220_s25 }
  0x12   :  { %v28_v22 = vstv %s228_s29  ;;  %v103_v23 = vmul.f32 %v145_v14, %v53_v16 }
  0x13   :  { %v45_v24 = vadd.f32 %v44_v15, %v35_v18  ;;  %v29_v25 = vmul.f32 %v28_v22, %v23_v0  ;;  %v37_v26 = vstv %s128_s7  ;;  %v94_v27 = vadd.f32 %v93_v17, %v84_v20 }
  0x14   :  { %v38_v28 = vmul.f32 %v126_v2, %v37_v26  ;;  %v47_v29 = vstv %s242_s12  ;;  %v78_v30 = vmul.f32 %v137_v1, %v28_v22  ;;  %v87_v31 = vmul.f32 %v139_v3, %v37_v26 }
  0x15   :  { %v55_v32 = vadd.f32 %v54_v19, %v45_v24  ;;  %v48_v33 = vmul.f32 %v129_v5, %v47_v29  ;;  %v57_v34 = vstv %s244_s13  ;;  %v104_v35 = vadd.f32 %v103_v23, %v94_v27 }
  0x16   :  { %v39_v36 = vadd.f32 %v38_v28, %v29_v25  ;;  %v58_v37 = vmul.f32 %v132_v9, %v57_v34  ;;  %v88_v38 = vadd.f32 %v87_v31, %v78_v30  ;;  %v97_v41 = vmul.f32 %v142_v6, %v47_v29 }
  0x17   :  { %v62_v39 = vadd.f32 %v61_v21, %v55_v32  ;;  %v111_v40 = vadd.f32 %v104_v35, %v61_v21  ;;  %v107_v42 = vmul.f32 %v145_v14, %v57_v34  ;;  %v66_v44 = vstv %s250_s16 }
  0x18   :  { %v49_v43 = vadd.f32 %v48_v33, %v39_v36  ;;  %v98_v45 = vadd.f32 %v97_v41, %v88_v38 }
  0x19   :  { %153 = vtanh.f32 %v62_v39 }
  0x1a   :  { %v59_v46 = vadd.f32 %v58_v37, %v49_v43  ;;  %155 = vtanh.f32 %v111_v40  ;;  %v108_v47 = vadd.f32 %v107_v42, %v98_v45 }
  0x1c   :  { %v67_v48 = vadd.f32 %v66_v44, %v59_v46  ;;  %v117_v49 = vadd.f32 %v108_v47, %v66_v44 }
  0x1e   :  { %157 = vtanh.f32 %v67_v48 }
  0x1f   :  { %v154_v50 = vpop.eup %153  ;;  %159 = vtanh.f32 %v117_v49 }
  0x20   :  { %v156_v51 = vpop.eup %155  ;;  %64 = vst [vmem:[%s271_s3] sm:$0x3] %v154_v50 }
  0x21   :  { %148 = vst [vmem:[%s271_s3 + $0x4] sm:$0x3] %v156_v51 }
  0x24   :  { %v158_v52 = vpop.eup %157 }
  0x25   :  { %v160_v53 = vpop.eup %159  ;;  %136 = vst [vmem:[%s271_s3 + $0x2] sm:$0x3] %v158_v52 }
  0x26   :  { %150 = vst [vmem:[%s271_s3 + $0x6] sm:$0x3] %v160_v53 }

</bundles_post_ra>
